<compile_context>
chip_gen: v5e
topology: v5e:2x2
jax: 0.10.0
libtpu: 0.0.40
codegen_flags: <defaults>
</compile_context>

<pallas_src>
from functools import partial

import jax
import jax.numpy as jnp
from jax.experimental import pallas as pl
from jax.experimental.pallas import tpu as pltpu


# ----------------------------------------------------------------------------
# Fused kernel
# ----------------------------------------------------------------------------
def strn_fused_kernel(v_ref, view_cell_ref, p512_ref, p48_ref, p128_ref,
                      vembT_ref, out_ref, *, batch, n_tgt, ch, emb, offs):
    f32 = jnp.float32
    bt = batch * n_tgt
    tch = n_tgt * ch
    d1 = p512_ref.shape[1]      # fc1 width (512)
    d3 = p128_ref.shape[1]      # fc3 width (128)

    # ---- static slab views (free; all section starts are 8-row aligned) ----
    w1 = p512_ref[offs['w1']:offs['w1'] + v_ref.shape[1], :]          # (vsize, 512)
    b1 = p512_ref[offs['b1']:offs['b1'] + 1, :]                       # (1, 512)

    w2 = p48_ref[offs['w2']:offs['w2'] + d1, :]                       # (512, T*ch)
    amask = p48_ref[offs['amask']:offs['amask'] + bt, :]              # (B*T, T*ch)
    rmat = p48_ref[offs['rmat']:offs['rmat'] + bt, :][:, :batch]      # (B*T, B)
    b2 = p48_ref[offs['b2']:offs['b2'] + 1, :]                        # (1, T*ch)

    w3t = p128_ref[offs['w3t']:offs['w3t'] + tch, :]                  # (T*ch, 128)
    w4ea = p128_ref[offs['w4ea']:offs['w4ea'] + d3, :]                # (128, 128), cols>E zero
    b3 = p128_ref[offs['b3']:offs['b3'] + 1, :]                       # (1, 128)
    b4ea = p128_ref[offs['b4ea']:offs['b4ea'] + 1, :]                 # (1, 128), cols>E zero

    # ---- v -> h2 = relu(fc2(relu(fc1(v))))                      (B, T*ch) --
    h1 = jnp.maximum(jnp.dot(v_ref[...], w1, preferred_element_type=f32) + b1, 0.0)
    h2 = jnp.maximum(jnp.dot(h1, w2, preferred_element_type=f32) + b2, 0.0)

    # ---- torch .view(-1, ch) + fc3 as batched matmuls (no value reshape) ---
    # h3[b*T+t, k] = relu(sum_c h2[b, t*ch + c] * w3[c, k] + b3[k])
    h2_rep = jnp.dot(rmat, h2, preferred_element_type=f32)            # (B*T, T*ch)
    h3 = jnp.maximum(
        jnp.dot(h2_rep * amask, w3t, preferred_element_type=f32) + b3, 0.0)  # (B*T, 128)

    # ---- fc4_emb and fc4_act in one MXU pass (zero-padded N=128) -----------
    emb_act = jnp.dot(h3, w4ea, preferred_element_type=f32) + b4ea    # (B*T, 128)
    wrd_emb = emb_act[:, :emb]                                        # (B*T, E)
    act_logit = emb_act[:, emb:emb + 1]                               # (B*T, 1)
    activation = pl.reciprocal(1.0 + jnp.exp(-act_logit), approx=False)   # sigmoid

    # ---- relation, softmax over views, routing ------------------------------
    relation = jnp.dot(wrd_emb, vembT_ref[...], preferred_element_type=f32)  # (B*T, P)
    rel_max = jnp.max(relation, axis=-1, keepdims=True)
    e = jnp.exp(relation - rel_max)
    attention = e * pl.reciprocal(jnp.sum(e, axis=-1, keepdims=True),
                                  approx=False)
    route = attention * activation                                    # (B*T, P)

    # ---- final bmm: wrd_cell[b,c,t] = sum_p view_cell[b,c,p] * route[b,t,p] -
    route3 = route.reshape(batch, n_tgt, route.shape[-1])             # tile-aligned regroup
    out_ref[...] = jnp.einsum('bcp,btp->bct', view_cell_ref[...], route3,
                              preferred_element_type=f32)


# ----------------------------------------------------------------------------
# One-time setup: pack params + hoisted view-code MLP (review items 1 & 2)
# ----------------------------------------------------------------------------
def _stack_aligned(blocks, ncols):
    """Stack 2-D f32 blocks along rows.  Columns are zero-padded to `ncols`;
    each section start is padded to a multiple of 8 rows so every in-kernel
    ref slice begins on a sublane-tile boundary.  Returns (slab, offsets)."""
    parts, offs, row = [], [], 0
    for blk in blocks:
        blk = jnp.asarray(blk, jnp.float32)
        r, c = blk.shape
        if c < ncols:
            blk = jnp.pad(blk, ((0, 0), (0, ncols - c)))
        parts.append(blk)
        offs.append(row)
        row += r
        pad = (-row) % 8
        if pad:
            parts.append(jnp.zeros((pad, ncols), jnp.float32))
            row += pad
    return jnp.concatenate(parts, axis=0), offs


def strn_prepare(params, *, batch, ch, n_tgt, im_size=(16, 16)):
    """Runs ONCE per parameter set (re-run if params change, e.g. training).
    Everything here is input independent, so it stays off the per-call path."""
    (w1, b1, w2, b2, w3, b3, w4a, b4a, w4e, b4e, wv1, bv1, wv2, bv2) = params
    f32 = jnp.float32
    emb = w4e.shape[1]

    # view-code MLP hoisted out of the kernel (function of params + fixed grid).
    xs = jnp.linspace(-1.0, 1.0, im_size[0])
    ys = jnp.linspace(-1.0, 1.0, im_size[1])
    xg, yg = jnp.meshgrid(xs, ys, indexing="ij")          # torch default 'ij'
    view_code = jnp.stack([xg.reshape(-1), yg.reshape(-1)], axis=1)   # (P, 2)
    hv = jnp.maximum(view_code @ wv1 + bv1, 0.0)
    view_embT = jnp.asarray((hv @ wv2 + bv2).T, f32)                  # (E, P)

    # exact repack of torch's .view(-1, ch): h3 = relu(((R@h2)*A)@tile(w3)+b3)
    rmat = jnp.repeat(jnp.eye(batch, dtype=f32), n_tgt, axis=0)        # (B*T, B)
    amask = jnp.tile(jnp.repeat(jnp.eye(n_tgt, dtype=f32), ch, axis=1),
                     (batch, 1))                                       # (B*T, T*ch)
    w3t = jnp.tile(w3, (n_tgt, 1))                                     # (T*ch, 128)
    w4ea = jnp.concatenate([w4e, w4a.T], axis=1)                       # (128, E+1)
    b4ea = jnp.concatenate([b4e, b4a], axis=1)                         # (1, E+1)

    p512, o512 = _stack_aligned([w1, b1], w1.shape[1])
    p48, o48 = _stack_aligned([w2, amask, rmat, b2], ch * n_tgt)
    p128, o128 = _stack_aligned([w3t, w4ea, b3, b4ea], w3.shape[1])

    offs = dict(w1=o512[0], b1=o512[1],
                w2=o48[0], amask=o48[1], rmat=o48[2], b2=o48[3],
                w3t=o128[0], w4ea=o128[1], b3=o128[2], b4ea=o128[3])
    arrays = (p512, p48, p128, view_embT)
    static = dict(offs=offs, batch=batch, ch=ch, n_tgt=n_tgt, emb=emb)
    return arrays, static


# ----------------------------------------------------------------------------
# Per-call wrapper: just the pallas_call (no param repacking here)
# ----------------------------------------------------------------------------
def strn_forward(view_cell, v, p512, p48, p128, view_embT, *,
                 offs, batch, ch, n_tgt, emb):
    tsize, views = view_cell.shape[1], view_cell.shape[2]
    bt = batch * n_tgt

    flops = 2 * (batch * v.shape[1] * p512.shape[1]          # fc1
                 + batch * p512.shape[1] * ch * n_tgt        # fc2
                 + bt * batch * ch * n_tgt                   # repack
                 + bt * ch * n_tgt * p128.shape[1]           # fc3
                 + bt * p128.shape[1] * p128.shape[1]        # fc4 (padded)
                 + bt * emb * views                          # relation
                 + batch * tsize * views * n_tgt)            # final bmm
    cost = pl.CostEstimate(
        flops=int(flops),
        transcendentals=int(bt * views + bt),
        bytes_accessed=int(4 * (v.size + view_cell.size + p512.size + p48.size
                                + p128.size + view_embT.size
                                + batch * tsize * n_tgt)))

    vmem = lambda: pl.BlockSpec(memory_space=pltpu.MemorySpace.VMEM)
    kernel = partial(strn_fused_kernel, batch=batch, n_tgt=n_tgt, ch=ch,
                     emb=emb, offs=offs)
    return pl.pallas_call(
        kernel,
        out_shape=jax.ShapeDtypeStruct((batch, tsize, n_tgt), jnp.float32),
        in_specs=[vmem() for _ in range(6)],
        out_specs=vmem(),
        cost_estimate=cost,
    )(v, view_cell, p512, p48, p128, view_embT)


# ----------------------------------------------------------------------------
# Pure-JAX reference mirroring the torch forward pass
# ----------------------------------------------------------------------------
def strn_forward_ref(view_cell, v, view_code, params, *, ch, n_tgt, emb):
    (w1, b1, w2, b2, w3, b3, w4a, b4a, w4e, b4e, wv1, bv1, wv2, bv2) = params
    B = v.shape[0]
    h1 = jax.nn.relu(v @ w1 + b1)
    h2 = jax.nn.relu(h1 @ w2 + b2).reshape(-1, ch)
    h3 = jax.nn.relu(h2 @ w3 + b3)
    activation = jax.nn.sigmoid((h3 @ w4a.T + b4a).reshape(B, n_tgt, 1))
    hv = jax.nn.relu(view_code @ wv1 + bv1)
    view_emb = hv @ wv2 + bv2                                  # (P, E)
    wrd_emb = (h3 @ w4e + b4e).reshape(B, n_tgt, emb)
    relation = jnp.einsum("bte,pe->btp", wrd_emb, view_emb)
    attention = jax.nn.softmax(relation, axis=2)
    route = attention * activation
    return jnp.einsum("bcp,btp->bct", view_cell, route)


if __name__ == "__main__":
    B = 2
    VSIZE = 8
    CH = 3
    N_TGT = 16
    EMB = 32
    TSIZE = 32
    IM = (16, 16)
    P = IM[0] * IM[1]

    key = jax.random.PRNGKey(0)
    keys = jax.random.split(key, 20)

    def linear_params(kw, kb, fan_in, fan_out):
        bound = 1.0 / jnp.sqrt(jnp.float32(fan_in))
        w = jax.random.uniform(kw, (fan_in, fan_out), jnp.float32, -bound, bound)
        b = jax.random.uniform(kb, (1, fan_out), jnp.float32, -bound, bound)
        return w, b

    w1, b1 = linear_params(keys[0], keys[1], VSIZE, 512)
    w2, b2 = linear_params(keys[2], keys[3], 512, CH * N_TGT)
    w3, b3 = linear_params(keys[4], keys[5], CH, 128)
    bound4 = 1.0 / jnp.sqrt(jnp.float32(128))
    w4a = jax.random.uniform(keys[6], (1, 128), jnp.float32, -bound4, bound4)   # torch (out=1, in=128)
    b4a = jax.random.uniform(keys[7], (1, 1), jnp.float32, -bound4, bound4)
    w4e, b4e = linear_params(keys[8], keys[9], 128, EMB)
    wv1, bv1 = linear_params(keys[10], keys[11], 2, 128)
    wv2, bv2 = linear_params(keys[12], keys[13], 128, EMB)
    # fc4_occ parameters exist in the module but its output is unused by forward().

    params = (w1, b1, w2, b2, w3, b3, w4a, b4a, w4e, b4e, wv1, bv1, wv2, bv2)

    v = jax.random.normal(keys[14], (B, VSIZE), jnp.float32)
    view_cell = jax.random.normal(keys[15], (B, TSIZE, P), jnp.float32)

    # ---- one-time setup (off the per-call path) ----------------------------
    prep_arrays, static = strn_prepare(params, batch=B, ch=CH, n_tgt=N_TGT, im_size=IM)
    prep_arrays = jax.block_until_ready(prep_arrays)

    # ---- per-call path: just the fused pallas_call --------------------------
    fwd = jax.jit(partial(strn_forward, **static))
    out = jax.block_until_ready(fwd(view_cell, v, *prep_arrays))

    # ---- reference check -----------------------------------------------------
    xs = jnp.linspace(-1.0, 1.0, IM[0])
    ys = jnp.linspace(-1.0, 1.0, IM[1])
    xg, yg = jnp.meshgrid(xs, ys, indexing="ij")
    view_code = jnp.stack([xg.reshape(-1), yg.reshape(-1)], axis=1)   # (P, 2)
    ref = strn_forward_ref(view_cell, v, view_code, params,
                           ch=CH, n_tgt=N_TGT, emb=EMB)

    assert out.shape == (B, TSIZE, N_TGT)
    assert jnp.allclose(out, ref, atol=1e-4, rtol=1e-4), "mismatch vs JAX reference"
    print("KERNEL_OK")
</pallas_src>

<mosaic_0001>
module attributes {stable_mosaic.version = 11 : i64} {
  func.func @strn_fused_kernel(%arg0: memref<2x8xf32, #tpu.memory_space<vmem>>, %arg1: memref<2x32x256xf32, #tpu.memory_space<vmem>>, %arg2: memref<16x512xf32, #tpu.memory_space<vmem>>, %arg3: memref<584x48xf32, #tpu.memory_space<vmem>>, %arg4: memref<192x128xf32, #tpu.memory_space<vmem>>, %arg5: memref<32x256xf32, #tpu.memory_space<vmem>>, %arg6: memref<2x32x16xf32, #tpu.memory_space<vmem>>) attributes {dimension_semantics = [], scalar_prefetch = 0 : i64, scratch_operands = 0 : i64, tpu.core_type = #tpu.core_type<tc>} {
    %c0 = arith.constant 0 : index
    %c0_0 = arith.constant 0 : index
    %0 = vector.load %arg2[%c0, %c0_0] : memref<16x512xf32, #tpu.memory_space<vmem>>, vector<8x512xf32>
    %c8 = arith.constant 8 : index
    %c0_1 = arith.constant 0 : index
    %1 = vector.load %arg2[%c8, %c0_1] : memref<16x512xf32, #tpu.memory_space<vmem>>, vector<1x512xf32>
    %c0_2 = arith.constant 0 : index
    %c0_3 = arith.constant 0 : index
    %2 = vector.load %arg3[%c0_2, %c0_3] : memref<584x48xf32, #tpu.memory_space<vmem>>, vector<512x48xf32>
    %c512 = arith.constant 512 : index
    %c0_4 = arith.constant 0 : index
    %3 = vector.load %arg3[%c512, %c0_4] : memref<584x48xf32, #tpu.memory_space<vmem>>, vector<32x48xf32>
    %c544 = arith.constant 544 : index
    %c0_5 = arith.constant 0 : index
    %4 = vector.load %arg3[%c544, %c0_5] : memref<584x48xf32, #tpu.memory_space<vmem>>, vector<32x48xf32>
    %5 = vector.extract_strided_slice %4 {offsets = [0, 0], sizes = [32, 2], strides = [1, 1]} : vector<32x48xf32> to vector<32x2xf32>
    %c576 = arith.constant 576 : index
    %c0_6 = arith.constant 0 : index
    %6 = vector.load %arg3[%c576, %c0_6] : memref<584x48xf32, #tpu.memory_space<vmem>>, vector<1x48xf32>
    %c0_7 = arith.constant 0 : index
    %c0_8 = arith.constant 0 : index
    %7 = vector.load %arg4[%c0_7, %c0_8] : memref<192x128xf32, #tpu.memory_space<vmem>>, vector<48x128xf32>
    %c48 = arith.constant 48 : index
    %c0_9 = arith.constant 0 : index
    %8 = vector.load %arg4[%c48, %c0_9] : memref<192x128xf32, #tpu.memory_space<vmem>>, vector<128x128xf32>
    %c176 = arith.constant 176 : index
    %c0_10 = arith.constant 0 : index
    %9 = vector.load %arg4[%c176, %c0_10] : memref<192x128xf32, #tpu.memory_space<vmem>>, vector<1x128xf32>
    %c184 = arith.constant 184 : index
    %c0_11 = arith.constant 0 : index
    %10 = vector.load %arg4[%c184, %c0_11] : memref<192x128xf32, #tpu.memory_space<vmem>>, vector<1x128xf32>
    %c0_12 = arith.constant 0 : index
    %c0_13 = arith.constant 0 : index
    %11 = vector.load %arg0[%c0_12, %c0_13] : memref<2x8xf32, #tpu.memory_space<vmem>>, vector<2x8xf32>
    %cst = arith.constant dense<0.000000e+00> : vector<2x512xf32>
    %12 = tpu.matmul %11, %0, %cst {dimension_numbers = #tpu.dot_dimension_numbers<[1], [0], [0], [1], [0, 0, 1, 1], [], []>} : vector<2x8xf32>, vector<8x512xf32>, vector<2x512xf32> -> vector<2x512xf32>
    %13 = vector.broadcast %1 : vector<1x512xf32> to vector<2x512xf32>
    %14 = arith.addf %12, %13 : vector<2x512xf32>
    %cst_14 = arith.constant 0.000000e+00 : f32
    %15 = vector.broadcast %cst_14 : f32 to vector<2x512xf32>
    %16 = arith.maximumf %14, %15 : vector<2x512xf32>
    %cst_15 = arith.constant dense<0.000000e+00> : vector<2x48xf32>
    %17 = tpu.matmul %16, %2, %cst_15 {dimension_numbers = #tpu.dot_dimension_numbers<[1], [0], [0], [1], [0, 0, 1, 1], [], []>} : vector<2x512xf32>, vector<512x48xf32>, vector<2x48xf32> -> vector<2x48xf32>
    %18 = vector.broadcast %6 : vector<1x48xf32> to vector<2x48xf32>
    %19 = arith.addf %17, %18 : vector<2x48xf32>
    %cst_16 = arith.constant 0.000000e+00 : f32
    %20 = vector.broadcast %cst_16 : f32 to vector<2x48xf32>
    %21 = arith.maximumf %19, %20 : vector<2x48xf32>
    %cst_17 = arith.constant dense<0.000000e+00> : vector<32x48xf32>
    %22 = tpu.matmul %5, %21, %cst_17 {dimension_numbers = #tpu.dot_dimension_numbers<[1], [0], [0], [1], [0, 0, 1, 1], [], []>} : vector<32x2xf32>, vector<2x48xf32>, vector<32x48xf32> -> vector<32x48xf32>
    %23 = arith.mulf %22, %3 : vector<32x48xf32>
    %cst_18 = arith.constant dense<0.000000e+00> : vector<32x128xf32>
    %24 = tpu.matmul %23, %7, %cst_18 {dimension_numbers = #tpu.dot_dimension_numbers<[1], [0], [0], [1], [0, 0, 1, 1], [], []>} : vector<32x48xf32>, vector<48x128xf32>, vector<32x128xf32> -> vector<32x128xf32>
    %25 = vector.broadcast %9 : vector<1x128xf32> to vector<32x128xf32>
    %26 = arith.addf %24, %25 : vector<32x128xf32>
    %cst_19 = arith.constant 0.000000e+00 : f32
    %27 = vector.broadcast %cst_19 : f32 to vector<32x128xf32>
    %28 = arith.maximumf %26, %27 : vector<32x128xf32>
    %cst_20 = arith.constant dense<0.000000e+00> : vector<32x128xf32>
    %29 = tpu.matmul %28, %8, %cst_20 {dimension_numbers = #tpu.dot_dimension_numbers<[1], [0], [0], [1], [0, 0, 1, 1], [], []>} : vector<32x128xf32>, vector<128x128xf32>, vector<32x128xf32> -> vector<32x128xf32>
    %30 = vector.broadcast %10 : vector<1x128xf32> to vector<32x128xf32>
    %31 = arith.addf %29, %30 : vector<32x128xf32>
    %32 = vector.extract_strided_slice %31 {offsets = [0, 0], sizes = [32, 32], strides = [1, 1]} : vector<32x128xf32> to vector<32x32xf32>
    %33 = vector.extract_strided_slice %31 {offsets = [0, 32], sizes = [32, 1], strides = [1, 1]} : vector<32x128xf32> to vector<32x1xf32>
    %cst_21 = arith.constant 0.000000e+00 : f32
    %34 = vector.broadcast %cst_21 : f32 to vector<32x1xf32>
    %35 = arith.subf %34, %33 : vector<32x1xf32>
    %36 = math.exp %35 : vector<32x1xf32>
    %cst_22 = arith.constant 1.000000e+00 : f32
    %37 = vector.broadcast %cst_22 : f32 to vector<32x1xf32>
    %38 = arith.addf %37, %36 : vector<32x1xf32>
    %39 = tpu.reciprocal %38 : vector<32x1xf32> -> vector<32x1xf32>
    %c0_23 = arith.constant 0 : index
    %c0_24 = arith.constant 0 : index
    %40 = vector.load %arg5[%c0_23, %c0_24] : memref<32x256xf32, #tpu.memory_space<vmem>>, vector<32x256xf32>
    %cst_25 = arith.constant dense<0.000000e+00> : vector<32x256xf32>
    %41 = tpu.matmul %32, %40, %cst_25 {dimension_numbers = #tpu.dot_dimension_numbers<[1], [0], [0], [1], [0, 0, 1, 1], [], []>} : vector<32x32xf32>, vector<32x256xf32>, vector<32x256xf32> -> vector<32x256xf32>
    %cst_26 = arith.constant dense<0xFF800000> : vector<32xf32>
    %42 = vector.multi_reduction <maximumf>, %41, %cst_26 [1] : vector<32x256xf32> to vector<32xf32>
    %43 = vector.shape_cast %42 : vector<32xf32> to vector<32x1xf32>
    %44 = vector.broadcast %43 : vector<32x1xf32> to vector<32x256xf32>
    %45 = arith.subf %41, %44 : vector<32x256xf32>
    %46 = math.exp %45 : vector<32x256xf32>
    %cst_27 = arith.constant dense<0.000000e+00> : vector<32xf32>
    %47 = vector.multi_reduction <add>, %46, %cst_27 [1] : vector<32x256xf32> to vector<32xf32>
    %48 = vector.shape_cast %47 : vector<32xf32> to vector<32x1xf32>
    %49 = tpu.reciprocal %48 : vector<32x1xf32> -> vector<32x1xf32>
    %50 = vector.broadcast %49 : vector<32x1xf32> to vector<32x256xf32>
    %51 = arith.mulf %46, %50 : vector<32x256xf32>
    %52 = vector.broadcast %39 : vector<32x1xf32> to vector<32x256xf32>
    %53 = arith.mulf %51, %52 : vector<32x256xf32>
    %54 = vector.shape_cast %53 : vector<32x256xf32> to vector<2x16x256xf32>
    %c0_28 = arith.constant 0 : index
    %c0_29 = arith.constant 0 : index
    %c0_30 = arith.constant 0 : index
    %55 = vector.load %arg1[%c0_28, %c0_29, %c0_30] : memref<2x32x256xf32, #tpu.memory_space<vmem>>, vector<2x32x256xf32>
    "tpu.trace_start"() <{level = 10 : i32, message = "bcp,btp->bct"}> : () -> ()
    %cst_31 = arith.constant dense<0.000000e+00> : vector<2x32x16xf32>
    %56 = tpu.matmul %55, %54, %cst_31 {dimension_numbers = #tpu.dot_dimension_numbers<[2], [2], [1], [1], [0, 0, 0, 1, 1, 1], [0], [0]>} : vector<2x32x256xf32>, vector<2x16x256xf32>, vector<2x32x16xf32> -> vector<2x32x16xf32>
    "tpu.trace_stop"() : () -> ()
    %c0_32 = arith.constant 0 : index
    %c0_33 = arith.constant 0 : index
    %c0_34 = arith.constant 0 : index
    %57 = vector.load %arg6[%c0_32, %c0_33, %c0_34] : memref<2x32x16xf32, #tpu.memory_space<vmem>>, vector<2x32x16xf32>
    tpu.vector_store %arg6[%c0_32, %c0_33, %c0_34], %56 {strides = array<i32>} : memref<2x32x16xf32, #tpu.memory_space<vmem>>, vector<2x32x16xf32>,
    return
  }
}

</mosaic_0001>

<bundles_post_ra>
// kernel: strn_forward.1
= control target key start
LH: loop header
LB: loop body
LE: loop exit
PB: predicated region body
PF: predicated region fallthrough
CT: control target
= control target key end

     0   :  { %vm136_vm0 = vcmask 64512   ;;  %vm319_vm1 = vcmask 1041408   ;;  %vm306_vm2 = vcmask 15360   ;;  %vm357_vm3 = vcmask 392192   ;;  %s1470_s2 = inlined_call_operand.vmem [shape: f32[16,512], index: 2, kind: input, shape index: {}]   ;;  %s1471_s0 = inlined_call_operand.vmem [shape: f32[2,8], index: 0, kind: input, shape index: {}]   ;;  %s1472_s3 = inlined_call_operand.vmem [shape: f32[584,48], index: 3, kind: input, shape index: {}]   ;;  %s1473_s4 = inlined_call_operand.vmem [shape: f32[192,128], index: 4, kind: input, shape index: {}]   ;;  %s1474_s5 = inlined_call_operand.vmem [shape: f32[32,256], index: 5, kind: input, shape index: {}]   ;;  %s1475_s1 = inlined_call_operand.vmem [shape: f32[2,32,256], index: 1, kind: input, shape index: {}]   ;;  %s1476_s6 = inlined_call_operand.vmem [shape: f32[2,32,16], index: 6, kind: output, shape index: {}]  }
   0x1   :  { %v25_v0 = vld [vmem:[%s1470_s2 + $0x10] sm:$0xff]  ;;  %v126_v1 = vld [vmem:[%s1471_s0] sm:$0x3]  ;;  %v26_v2 = vld [vmem:[%s1470_s2 + $0x18] sm:$0xff]  ;;  %vm513_vm4 = vcmask 261120  }
   0x2   :  { %195 = vmatpush.msra.mxu2 %v25_v0  ;;  %215 = vmatpush.msra.mxu3 %v26_v2  ;;  %v23_v3 = vld [vmem:[%s1470_s2] sm:$0xff]  ;;  %v24_v4 = vld [vmem:[%s1470_s2 + $0x8] sm:$0xff]  ;;  %v76_v5 = vld [vmem:[%s1472_s3 + $0x178] sm:$0xff] }
   0x3   :  { %872 = vmatmul.msk.f32.vlgmr.msra.gmra.mxu2 %vm136_vm0, %v126_v1  ;;  %873 = vmatmul.msk.f32.vlgmr.msra.gmra.mxu3 %vm136_vm0, %v126_v1  ;;  %v44_v6 = vld [vmem:[%s1472_s3 + $0x78] sm:$0xff]  ;;  %v75_v9 = vld [vmem:[%s1472_s3 + $0x170] sm:$0xff]  ;;  %v74_v13 = vld [vmem:[%s1472_s3 + $0x168] sm:$0xff] }
   0x4   :  { %155 = vmatpush.msra.mxu0 %v23_v3  ;;  %175 = vmatpush.msra.mxu1 %v24_v4  ;;  %v92_v7 = vld [vmem:[%s1472_s3 + $0x1f8] sm:$0xff]  ;;  %v43_v10 = vld [vmem:[%s1472_s3 + $0x70] sm:$0xff]  ;;  %v42_v14 = vld [vmem:[%s1472_s3 + $0x68] sm:$0xff] }
   0x5   :  { %v60_v8 = vld [vmem:[%s1472_s3 + $0xf8] sm:$0xff]  ;;  %870 = vmatmul.msk.f32.vlgmr.msra.gmra.mxu0 %vm136_vm0, %v126_v1  ;;  %871 = vmatmul.msk.f32.vlgmr.msra.gmra.mxu1 %vm136_vm0, %v126_v1  ;;  %v91_v11 = vld [vmem:[%s1472_s3 + $0x1f0] sm:$0xff]  ;;  %v90_v15 = vld [vmem:[%s1472_s3 + $0x1e8] sm:$0xff] }
   0x6   :  { %265 = vmatpush.msrb.mxu2 %v76_v5  ;;  %225 = vmatpush.msrb.mxu0 %v44_v6  ;;  %v59_v12 = vld [vmem:[%s1472_s3 + $0xf0] sm:$0xff]  ;;  %v58_v16 = vld [vmem:[%s1472_s3 + $0xe8] sm:$0xff]  ;;  %v73_v17 = vld [vmem:[%s1472_s3 + $0x160] sm:$0xff] }
   0x7   :  { %285 = vmatpush.msrb.mxu3 %v92_v7  ;;  %245 = vmatpush.msrb.mxu1 %v60_v8  ;;  %v41_v18 = vld [vmem:[%s1472_s3 + $0x60] sm:$0xff]  ;;  %v72_v21 = vld [vmem:[%s1472_s3 + $0x158] sm:$0xff]  ;;  %v71_v25 = vld [vmem:[%s1472_s3 + $0x150] sm:$0xff] }
   0x8   :  { %266 = vmatpush.msrb.mxu2 %v75_v9  ;;  %226 = vmatpush.msrb.mxu0 %v43_v10  ;;  %v89_v19 = vld [vmem:[%s1472_s3 + $0x1e0] sm:$0xff]  ;;  %v40_v22 = vld [vmem:[%s1472_s3 + $0x58] sm:$0xff]  ;;  %v39_v26 = vld [vmem:[%s1472_s3 + $0x50] sm:$0xff] }
   0x9   :  { %286 = vmatpush.msrb.mxu3 %v91_v11  ;;  %246 = vmatpush.msrb.mxu1 %v59_v12  ;;  %v57_v20 = vld [vmem:[%s1472_s3 + $0xe0] sm:$0xff]  ;;  %v88_v23 = vld [vmem:[%s1472_s3 + $0x1d8] sm:$0xff]  ;;  %v87_v27 = vld [vmem:[%s1472_s3 + $0x1d0] sm:$0xff] }
   0xa   :  { %267 = vmatpush.msrb.mxu2 %v74_v13  ;;  %227 = vmatpush.msrb.mxu0 %v42_v14  ;;  %v56_v24 = vld [vmem:[%s1472_s3 + $0xd8] sm:$0xff]  ;;  %v55_v28 = vld [vmem:[%s1472_s3 + $0xd0] sm:$0xff]  ;;  %v70_v29 = vld [vmem:[%s1472_s3 + $0x148] sm:$0xff] }
   0xb   :  { %287 = vmatpush.msrb.mxu3 %v90_v15  ;;  %247 = vmatpush.msrb.mxu1 %v58_v16  ;;  %v38_v30 = vld [vmem:[%s1472_s3 + $0x48] sm:$0xff]  ;;  %v69_v33 = vld [vmem:[%s1472_s3 + $0x140] sm:$0xff]  ;;  %v68_v37 = vld [vmem:[%s1472_s3 + $0x138] sm:$0xff] }
   0xc   :  { %268 = vmatpush.msrb.mxu2 %v73_v17  ;;  %228 = vmatpush.msrb.mxu0 %v41_v18  ;;  %v86_v31 = vld [vmem:[%s1472_s3 + $0x1c8] sm:$0xff]  ;;  %v37_v34 = vld [vmem:[%s1472_s3 + $0x40] sm:$0xff]  ;;  %v36_v38 = vld [vmem:[%s1472_s3 + $0x38] sm:$0xff] }
   0xd   :  { %288 = vmatpush.msrb.mxu3 %v89_v19  ;;  %248 = vmatpush.msrb.mxu1 %v57_v20  ;;  %v54_v32 = vld [vmem:[%s1472_s3 + $0xc8] sm:$0xff]  ;;  %v85_v35 = vld [vmem:[%s1472_s3 + $0x1c0] sm:$0xff]  ;;  %v84_v39 = vld [vmem:[%s1472_s3 + $0x1b8] sm:$0xff] }
   0xe   :  { %269 = vmatpush.msrb.mxu2 %v72_v21  ;;  %229 = vmatpush.msrb.mxu0 %v40_v22  ;;  %v53_v36 = vld [vmem:[%s1472_s3 + $0xc0] sm:$0xff]  ;;  %v52_v40 = vld [vmem:[%s1472_s3 + $0xb8] sm:$0xff]  ;;  %v67_v41 = vld [vmem:[%s1472_s3 + $0x130] sm:$0xff] }
   0xf   :  { %289 = vmatpush.msrb.mxu3 %v88_v23  ;;  %249 = vmatpush.msrb.mxu1 %v56_v24  ;;  %v35_v42 = vld [vmem:[%s1472_s3 + $0x30] sm:$0xff]  ;;  %v66_v45 = vld [vmem:[%s1472_s3 + $0x128] sm:$0xff]  ;;  %v65_v49 = vld [vmem:[%s1472_s3 + $0x120] sm:$0xff] }
  0x10   :  { %270 = vmatpush.msrb.mxu2 %v71_v25  ;;  %230 = vmatpush.msrb.mxu0 %v39_v26  ;;  %v83_v43 = vld [vmem:[%s1472_s3 + $0x1b0] sm:$0xff]  ;;  %v34_v46 = vld [vmem:[%s1472_s3 + $0x28] sm:$0xff]  ;;  %v33_v50 = vld [vmem:[%s1472_s3 + $0x20] sm:$0xff] }
  0x11   :  { %290 = vmatpush.msrb.mxu3 %v87_v27  ;;  %250 = vmatpush.msrb.mxu1 %v55_v28  ;;  %v51_v44 = vld [vmem:[%s1472_s3 + $0xb0] sm:$0xff]  ;;  %v82_v47 = vld [vmem:[%s1472_s3 + $0x1a8] sm:$0xff]  ;;  %v81_v51 = vld [vmem:[%s1472_s3 + $0x1a0] sm:$0xff] }
  0x12   :  { %271 = vmatpush.msrb.mxu2 %v70_v29  ;;  %231 = vmatpush.msrb.mxu0 %v38_v30  ;;  %v50_v48 = vld [vmem:[%s1472_s3 + $0xa8] sm:$0xff]  ;;  %v64_v52 = vld [vmem:[%s1472_s3 + $0x118] sm:$0xff]  ;;  %v49_v54 = vld [vmem:[%s1472_s3 + $0xa0] sm:$0xff] }
  0x13   :  { %291 = vmatpush.msrb.mxu3 %v86_v31  ;;  %251 = vmatpush.msrb.mxu1 %v54_v32  ;;  %v32_v53 = vld [vmem:[%s1472_s3 + $0x18] sm:$0xff]  ;;  %v63_v55 = vld [vmem:[%s1472_s3 + $0x110] sm:$0xff]  ;;  %v62_v59 = vld [vmem:[%s1472_s3 + $0x108] sm:$0xff] }
  0x14   :  { %272 = vmatpush.msrb.mxu2 %v69_v33  ;;  %232 = vmatpush.msrb.mxu0 %v37_v34  ;;  %v80_v56 = vld [vmem:[%s1472_s3 + $0x198] sm:$0xff]  ;;  %v31_v57 = vld [vmem:[%s1472_s3 + $0x10] sm:$0xff]  ;;  %v30_v61 = vld [vmem:[%s1472_s3 + $0x8] sm:$0xff] }
  0x15   :  { %292 = vmatpush.msrb.mxu3 %v85_v35  ;;  %252 = vmatpush.msrb.mxu1 %v53_v36  ;;  %v48_v58 = vld [vmem:[%s1472_s3 + $0x98] sm:$0xff]  ;;  %v79_v60 = vld [vmem:[%s1472_s3 + $0x190] sm:$0xff]  ;;  %v61_v63 = vld [vmem:[%s1472_s3 + $0x100] sm:$0xff] }
  0x16   :  { %273 = vmatpush.msrb.mxu2 %v68_v37  ;;  %233 = vmatpush.msrb.mxu0 %v36_v38  ;;  %v47_v62 = vld [vmem:[%s1472_s3 + $0x90] sm:$0xff]  ;;  %v78_v0 = vld [vmem:[%s1472_s3 + $0x188] sm:$0xff]  ;;  %v29_v1 = vld [vmem:[%s1472_s3] sm:$0xff] }
  0x17   :  { %293 = vmatpush.msrb.mxu3 %v84_v39  ;;  %253 = vmatpush.msrb.mxu1 %v52_v40  ;;  %v46_v2 = vld [vmem:[%s1472_s3 + $0x88] sm:$0xff]  ;;  %v77_v3 = vld [vmem:[%s1472_s3 + $0x180] sm:$0xff]  ;;  %v105_v24 = vld [vmem:[%s1473_s4 + $0x18] sm:$0xff] }
  0x18   :  { %274 = vmatpush.msrb.mxu2 %v67_v41  ;;  %234 = vmatpush.msrb.mxu0 %v35_v42  ;;  %v45_v4 = vld [vmem:[%s1472_s3 + $0x80] sm:$0xff]  ;;  %v107_v22 = vld [vmem:[%s1473_s4 + $0x28] sm:$0xff]  ;;  %v104_v25 = vld [vmem:[%s1473_s4 + $0x10] sm:$0xff] }
  0x19   :  { %294 = vmatpush.msrb.mxu3 %v83_v43  ;;  %254 = vmatpush.msrb.mxu1 %v51_v44  ;;  %v869_v5 = vld [vmem:[%s1470_s2 + $0x20] ss:$8 sm:$0xf] }
  0x1a   :  { %275 = vmatpush.msrb.mxu2 %v66_v45  ;;  %235 = vmatpush.msrb.mxu0 %v34_v46  ;;  %v128_v6 = vperm.slane %v869_v5, 0  ;;  %v129_v7 = vperm.slane %v869_v5, 1  ;;  %v130_v10 = vperm.slane %v869_v5, 2  ;;  %v131_v12 = vperm.slane %v869_v5, 3  ;;  %v106_v23 = vld [vmem:[%s1473_s4 + $0x20] sm:$0xff]  ;;  %v99_v37 = vld [vmem:[%s1472_s3 + $0x230] sm:$0xff] }
  0x1b   :  { %295 = vmatpush.msrb.mxu3 %v82_v47  ;;  %255 = vmatpush.msrb.mxu1 %v50_v48  ;;  %v912_v26 = vld [vmem:[%s1472_s3 + $0x240] ss:$0 sm:$0xff]  ;;  %v98_v38 = vld [vmem:[%s1472_s3 + $0x228] sm:$0xff]  ;;  %v100_v39 = vld [vmem:[%s1472_s3 + $0x238] sm:$0xff] }
  0x1c   :  { %276 = vmatpush.msrb.mxu2 %v65_v49  ;;  %236 = vmatpush.msrb.mxu0 %v33_v50  ;;  %v97_v36 = vld [vmem:[%s1472_s3 + $0x220] sm:$0xff]  ;;  %v103_v40 = vld [vmem:[%s1473_s4 + $0x8] sm:$0xff]  ;;  %v121_v44 = vld [vmem:[%s1473_s4 + $0x98] sm:$0xff] }
  0x1d   :  { %296 = vmatpush.msrb.mxu3 %v81_v51  ;;  %256 = vmatpush.msrb.mxu1 %v49_v54  ;;  %v102_v41 = vld [vmem:[%s1473_s4] sm:$0xff]  ;;  %v123_v42 = vld [vmem:[%s1473_s4 + $0xa8] sm:$0xff]  ;;  %v120_v46 = vld [vmem:[%s1473_s4 + $0x90] sm:$0xff] }
  0x1e   :  { %277 = vmatpush.msrb.mxu2 %v64_v52  ;;  %237 = vmatpush.msrb.mxu0 %v32_v53  ;;  %v122_v43 = vld [vmem:[%s1473_s4 + $0xa0] sm:$0xff]  ;;  %v119_v49 = vld [vmem:[%s1473_s4 + $0x88] sm:$0xff]  ;;  %v117_v51 = vld [vmem:[%s1473_s4 + $0x78] sm:$0xff] }
  0x1f   :  { %297 = vmatpush.msrb.mxu3 %v80_v56  ;;  %257 = vmatpush.msrb.mxu1 %v48_v58  ;;  %v93_v45 = vld [vmem:[%s1472_s3 + $0x200] sm:$0xff]  ;;  %v94_v52 = vld [vmem:[%s1472_s3 + $0x208] sm:$0xff]  ;;  %v116_v53 = vld [vmem:[%s1473_s4 + $0x70] sm:$0xff] }
  0x20   :  { %278 = vmatpush.msrb.mxu2 %v63_v55  ;;  %238 = vmatpush.msrb.mxu0 %v31_v57  ;;  %v118_v50 = vld [vmem:[%s1473_s4 + $0x80] sm:$0xff]  ;;  %v115_v56 = vld [vmem:[%s1473_s4 + $0x68] sm:$0xff]  ;;  %v108_v5 = vld [vmem:[%s1473_s4 + $0x30] sm:$0xff] }
  0x21   :  { %298 = vmatpush.msrb.mxu3 %v79_v60  ;;  %258 = vmatpush.msrb.mxu1 %v47_v62  ;;  %v114_v58 = vld [vmem:[%s1473_s4 + $0x60] sm:$0xff]  ;;  %v113_v60 = vld [vmem:[%s1473_s4 + $0x58] sm:$0xff]  ;;  %v112_v62 = vld [vmem:[%s1473_s4 + $0x50] sm:$0xff] }
  0x22   :  { %279 = vmatpush.msrb.mxu2 %v62_v59  ;;  %239 = vmatpush.msrb.mxu0 %v30_v61  ;;  %v95_v59 = vld [vmem:[%s1472_s3 + $0x210] sm:$0xff] }
  0x23   :  { %299 = vmatpush.msrb.mxu3 %v78_v0  ;;  %259 = vmatpush.msrb.mxu1 %v46_v2  ;;  %v96_v0 = vld [vmem:[%s1472_s3 + $0x218] sm:$0xff] }
  0x24   :  { %280 = vmatpush.msrb.mxu2 %v61_v63  ;;  %240 = vmatpush.msrb.mxu0 %v29_v1  ;;  %v111_v63 = vld [vmem:[%s1473_s4 + $0x48] sm:$0xff] }
  0x25   :  { %300 = vmatpush.msrb.mxu3 %v77_v3  ;;  %260 = vmatpush.msrb.mxu1 %v45_v4  ;;  %v110_v3 = vld [vmem:[%s1473_s4 + $0x40] sm:$0xff]  ;;  %v109_v4 = vld [vmem:[%s1473_s4 + $0x38] sm:$0xff] }
  0x26   :  { %892 = vmatpush.msra.mxu2 %v123_v42 }
  0x27   :  { %380 = vmatpush.msra.mxu1 %v107_v22 }
  0x28   :  { %893 = vmatpush.msra.mxu2 %v122_v43 }
  0x29   :  { %381 = vmatpush.msra.mxu1 %v106_v23  ;;  %v507_v23 = vld [vmem:[%s1474_s5 + $0x10] sm:$0xff] }
  0x2a   :  { %894 = vmatpush.msra.mxu2 %v121_v44 }
  0x2b   :  { %382 = vmatpush.msra.mxu1 %v105_v24  ;;  %v508_v24 = vld [vmem:[%s1474_s5 + $0x18] sm:$0xff] }
  0x2c   :  { %895 = vmatpush.msra.mxu2 %v120_v46 }
  0x2d   :  { %383 = vmatpush.msra.mxu1 %v104_v25  ;;  %v505_v25 = vld [vmem:[%s1474_s5] sm:$0xff] }
  0x2e   :  { %896 = vmatpush.msra.mxu2 %v119_v49 }
  0x2f   :  { %384 = vmatpush.msra.mxu1 %v103_v40 }
  0x30   :  { %897 = vmatpush.msra.mxu2 %v118_v50 }
  0x31   :  { %385 = vmatpush.msra.mxu1 %v102_v41 }
  0x32   :  { %898 = vmatpush.msra.mxu2 %v117_v51 }
  0x34   :  { %899 = vmatpush.msra.mxu2 %v116_v53 }
  0x36   :  { %900 = vmatpush.msra.mxu2 %v115_v56 }
  0x38   :  { %901 = vmatpush.msra.mxu2 %v114_v58 }
  0x3a   :  { %902 = vmatpush.msra.mxu2 %v113_v60 }
  0x3c   :  { %903 = vmatpush.msra.mxu2 %v112_v62 }
  0x3e   :  { %904 = vmatpush.msra.mxu2 %v111_v63 }
  0x40   :  { %905 = vmatpush.msra.mxu2 %v110_v3 }
  0x42   :  { %906 = vmatpush.msra.mxu2 %v109_v4 }
  0x44   :  { %907 = vmatpush.msra.mxu2 %v108_v5 }
  0x82   :  { %v157_v8 = vpop.f32.mrf.mxu0  ;;  %v177_v9 = vpop.f32.mrf.mxu1 }
  0x83   :  { %v158_v11 = vadd.f32 %v157_v8, %v128_v6  ;;  %v178_v13 = vadd.f32 %v177_v9, %v129_v7  ;;  %v913_v6 = vld [vmem:[%s1473_s4 + $0xb0] ss:$0 sm:$0xff]  ;;  %v512_v8 = vld [vmem:[%s1474_s5 + $0x38] sm:$0xff]  ;;  %v509_v9 = vld [vmem:[%s1474_s5 + $0x20] sm:$0xff] }
  0x84   :  { %v511_v7 = vld [vmem:[%s1474_s5 + $0x30] sm:$0xff] }
  0x85   :  { %v220_v14 = vmax.f32 %v158_v11, 0.0  ;;  %v221_v15 = vmax.f32 %v178_v13, 0.0 }
  0x86   :  { %v197_v16 = vpop.f32.mrf.mxu2  ;;  %v217_v17 = vpop.f32.mrf.mxu3 }
  0x87   :  { %v198_v18 = vadd.f32 %v197_v16, %v130_v10  ;;  %v218_v19 = vadd.f32 %v217_v17, %v131_v12  ;;  %241 = vmatmul.f32.vlgmr.msrb.gmra.mxu0 %v220_v14  ;;  %261 = vmatmul.f32.vlgmr.msrb.gmra.mxu1 %v221_v15  ;;  %v510_v10 = vld [vmem:[%s1474_s5 + $0x28] sm:$0xff] }
  0x88   :  { %404 = vmatpush.msrb.mxu1 %v123_v42 }
  0x89   :  { %v222_v20 = vmax.f32 %v198_v18, 0.0  ;;  %v223_v21 = vmax.f32 %v218_v19, 0.0 }
  0x8a   :  { %405 = vmatpush.msrb.mxu1 %v122_v43 }
  0x8b   :  { %281 = vmatmul.f32.vlgmr.msrb.gmra.mxu2 %v222_v20  ;;  %301 = vmatmul.f32.vlgmr.msrb.gmra.mxu3 %v223_v21 }
  0x8c   :  { %406 = vmatpush.msrb.mxu1 %v121_v44 }
  0x8e   :  { %407 = vmatpush.msrb.mxu1 %v120_v46 }
  0x90   :  { %408 = vmatpush.msrb.mxu1 %v119_v49 }
  0x92   :  { %409 = vmatpush.msrb.mxu1 %v118_v50 }
  0x94   :  { %410 = vmatpush.msrb.mxu1 %v117_v51 }
  0x96   :  { %411 = vmatpush.msrb.mxu1 %v116_v53 }
  0x98   :  { %412 = vmatpush.msrb.mxu1 %v115_v56 }
  0x9a   :  { %413 = vmatpush.msrb.mxu1 %v114_v58 }
  0x9c   :  { %414 = vmatpush.msrb.mxu1 %v113_v60 }
  0x9e   :  { %415 = vmatpush.msrb.mxu1 %v112_v62 }
  0xa0   :  { %416 = vmatpush.msrb.mxu1 %v111_v63 }
  0xa2   :  { %417 = vmatpush.msrb.mxu1 %v110_v3 }
  0xa4   :  { %418 = vmatpush.msrb.mxu1 %v109_v4 }
  0xa6   :  { %419 = vmatpush.msrb.mxu1 %v108_v5 }
 0x104   :  { %v242_v27 = vpop.f32.mrf.mxu0  ;;  %v262_v29 = vpop.f32.mrf.mxu1 }
 0x105   :  { %v243_v28 = vadd.f32 %v912_v26, %v242_v27  ;;  %v506_v26 = vld [vmem:[%s1474_s5 + $0x8] sm:$0xff]  ;;  %v914_v27 = vld [vmem:[%s1473_s4 + $0xb8] ss:$0 sm:$0xff] }
 0x107   :  { %v263_v30 = vadd.f32 %v262_v29, %v243_v28 }
 0x10e   :  { %v282_v31 = vpop.f32.mrf.mxu2  ;;  %v302_v32 = vpop.f32.mrf.mxu3 }
 0x10f   :  { %v283_v33 = vadd.f32 %v282_v31, %v263_v30  ;;  %v955_v31 = vmov 32  }
 0x110   :  { %909 = vset.pattern.permute.xlu2 %v955_v31  ;;  %910 = vset.pattern.permute.xlu0 %v955_v31 }
 0x111   :  { %v303_v34 = vadd.f32 %v302_v32, %v283_v33  ;;  %911 = vset.pattern.permute.xlu1 %v955_v31 }
 0x113   :  { %v305_v35 = vmax.f32 %v303_v34, 0.0 }
 0x115   :  { %874 = vmatpush.msk.msra.mxu0 %vm319_vm1, %v305_v35  ;;  %891 = vmatpush.msk.msra.mxu3 %vm319_vm1, %v305_v35 }
 0x116   :  { %875 = vmatmul.msk.f32.vlgmr.msra.gmra.mxu0 %vm306_vm2, %v97_v36  ;;  %877 = vmatmul.msk.f32.vlgmr.msra.gmra.mxu3 %vm306_vm2, %v99_v37 }
 0x117   :  { %538 = vmatpush.msrb.mxu3 %v511_v7  ;;  %567 = vmatpush.msrb.mxu0 %v512_v8 }
 0x119   :  { %539 = vmatpush.msrb.mxu3 %v509_v9  ;;  %568 = vmatpush.msrb.mxu0 %v510_v10 }
 0x11b   :  { %540 = vmatpush.msrb.mxu3 %v507_v23  ;;  %569 = vmatpush.msrb.mxu0 %v508_v24 }
 0x11d   :  { %541 = vmatpush.msrb.mxu3 %v505_v25  ;;  %570 = vmatpush.msrb.mxu0 %v506_v26 }
 0x11e   :  { %876 = vmatmul.msk.f32.gmra.mxu0 %vm306_vm2, %v98_v38  ;;  %878 = vmatmul.msk.f32.gmra.mxu3 %vm306_vm2, %v100_v39 }
 0x193   :  { %v340_v47 = vpop.f32.mrf.mxu0 }
 0x194   :  { %v352_v48 = vmul.f32 %v340_v47, %v93_v45 }
 0x196   :  { %879 = vmatmul.msk.f32.vlgmr.msra.gmra.mxu1 %vm357_vm3, %v352_v48 }
 0x199   :  { %v346_v57 = vpop.f32.mrf.mxu3 }
 0x19a   :  { %v354_v61 = vmul.f32 %v346_v57, %v95_v59 }
 0x19b   :  { %v343_v54 = vpop.f32.mrf.mxu0 }
 0x19c   :  { %v353_v55 = vmul.f32 %v343_v54, %v94_v52 }
 0x19e   :  { %880 = vmatmul.msk.f32.gmra.mxu1 %vm357_vm3, %v353_v55 }
 0x1a1   :  { %v349_v1 = vpop.f32.mrf.mxu3 }
 0x1a2   :  { %v355_v2 = vmul.f32 %v349_v1, %v96_v0 }
 0x1a6   :  { %881 = vmatmul.msk.f32.gmra.mxu1 %vm357_vm3, %v354_v61 }
 0x1ae   :  { %882 = vmatmul.msk.f32.gmra.mxu1 %vm357_vm3, %v355_v2 }
 0x213   :  { %v387_v11 = vpop.f32.mrf.mxu1 }
 0x214   :  { %v388_v12 = vadd.f32 %v913_v6, %v387_v11 }
 0x216   :  { %v399_v13 = vmax.f32 %v388_v12, 0.0 }
 0x218   :  { %420 = vmatmul.f32.vlgmr.msrb.gmra.mxu1 %v399_v13 }
 0x21b   :  { %v390_v14 = vpop.f32.mrf.mxu1 }
 0x21c   :  { %v391_v15 = vadd.f32 %v913_v6, %v390_v14 }
 0x21e   :  { %v400_v16 = vmax.f32 %v391_v15, 0.0 }
 0x220   :  { %423 = vmatmul.f32.vlgmr.msra.gmra.mxu2 %v400_v16 }
 0x223   :  { %v393_v17 = vpop.f32.mrf.mxu1 }
 0x224   :  { %v394_v18 = vadd.f32 %v913_v6, %v393_v17 }
 0x226   :  { %v401_v19 = vmax.f32 %v394_v18, 0.0 }
 0x228   :  { %426 = vmatmul.f32.gmra.mxu2 %v401_v19 }
 0x22b   :  { %v396_v20 = vpop.f32.mrf.mxu1 }
 0x22c   :  { %v397_v21 = vadd.f32 %v913_v6, %v396_v20 }
 0x22e   :  { %v402_v22 = vmax.f32 %v397_v21, 0.0 }
 0x230   :  { %429 = vmatmul.f32.gmra.mxu2 %v402_v22 }
 0x295   :  { %v421_v28 = vpop.f32.mrf.mxu1 }
 0x296   :  { %v1332_v29 = vadd.f32 %v914_v27, %v421_v28 }
 0x298   :  { %883 = vmatmul.msk.f32.vlgmr.msrb.gmra.mxu3 %vm513_vm4, %v1332_v29  ;;  %887 = vmatmul.msk.f32.vlgmr.msrb.gmra.mxu0 %vm513_vm4, %v1332_v29  ;;  %v433_v9 = vsub.f32 0.0, %v1332_v29 }
 0x29a   :  { %v437_v13 = vmul.f32 1.442695, %v433_v9 }
 0x2a3   :  { %v424_v30 = vpop.f32.mrf.mxu2 }
 0x2a4   :  { %v425_v32 = vadd.f32 %v914_v27, %v424_v30 }
 0x2a6   :  { %v434_v33 = vsub.f32 0.0, %v425_v32  ;;  %884 = vmatmul.msk.f32.gmra.mxu3 %vm513_vm4, %v425_v32  ;;  %888 = vmatmul.msk.f32.gmra.mxu0 %vm513_vm4, %v425_v32 }
 0x2a8   :  { %v439_v34 = vmul.f32 1.442695, %v434_v33 }
 0x2aa   :  { %915 = vpow2.f32 %v439_v34 }
 0x2ab   :  { %v427_v35 = vpop.f32.mrf.mxu2 }
 0x2ac   :  { %v1340_v36 = vadd.f32 %v914_v27, %v427_v35 }
 0x2ae   :  { %885 = vmatmul.msk.f32.gmra.mxu3 %vm513_vm4, %v1340_v36  ;;  %889 = vmatmul.msk.f32.gmra.mxu0 %vm513_vm4, %v1340_v36  ;;  %v435_v20 = vsub.f32 0.0, %v1340_v36 }
 0x2b0   :  { %v916_v37 = vpop.eup %915  ;;  %v441_v22 = vmul.f32 1.442695, %v435_v20 }
 0x2b1   :  { %v446_v38 = vadd.f32 1.0, %v916_v37 }
 0x2b3   :  { %917 = vrcp.f32 %v446_v38  ;;  %v430_v39 = vpop.f32.mrf.mxu2  ;;  %v474_v44 = vand.u32 2147483648, %v446_v38  ;;  %v472_v46 = vand.u32 2147483647, %v446_v38  ;;  %vm468_vm6 = vweird.f32 %v446_v38 }
 0x2b4   :  { %v431_v40 = vadd.f32 %v914_v27, %v430_v39 }
 0x2b5   :  { %v475_v48 = vor.u32 1.1754944e-38, %v474_v44  ;;  %vm473_vm8 = vcmp.eq.f32.partialorder %v472_v46, 8.507059e+37 }
 0x2b6   :  { %886 = vmatmul.msk.f32.gmra.mxu3 %vm513_vm4, %v431_v40  ;;  %890 = vmatmul.msk.f32.gmra.mxu0 %vm513_vm4, %v431_v40  ;;  %v436_v63 = vsub.f32 0.0, %v431_v40 }
 0x2b8   :  { %v443_v0 = vmul.f32 1.442695, %v436_v63 }
 0x2b9   :  { %v918_v41 = vpop.eup %917 }
 0x2ba   :  { %v464_v42 = vmul.f32 %v918_v41, %v446_v38  ;;  %vm469_vm5 = vweird.f32 %v918_v41  ;;  %919 = vpow2.f32 %v443_v0 }
 0x2bb   :  { %vm470_vm7 = vmor %vm468_vm6, %vm469_vm5 }
 0x2bc   :  { %v465_v43 = vsub.f32 1.0, %v464_v42 }
 0x2be   :  { %v466_v45 = vmul.f32 %v918_v41, %v465_v43 }
 0x2c0   :  { %v467_v47 = vadd.f32 %v918_v41, %v466_v45  ;;  %v920_v1 = vpop.eup %919 }
 0x2c1   :  { %v448_v2 = vadd.f32 1.0, %v920_v1 }
 0x2c2   :  { %v471_v49 = vsel %vm470_vm7, %v918_v41, %v467_v47 }
 0x2c3   :  { %v476_v50 = vsel %vm473_vm8, %v475_v48, %v471_v49  ;;  %921 = vrcp.f32 %v448_v2  ;;  %v502_v34 = vand.u32 2147483648, %v448_v2  ;;  %vm496_vm10 = vweird.f32 %v448_v2 }
 0x2c4   :  { %703 = vperm.xlu2 %909, %v476_v50   ;;  %v500_v36 = vand.u32 2147483647, %v448_v2 }
 0x2c5   :  { %v503_v42 = vor.u32 1.1754944e-38, %v502_v34 }
 0x2c6   :  { %vm501_vm12 = vcmp.eq.f32.partialorder %v500_v36, 8.507059e+37 }
 0x2c9   :  { %v922_v8 = vpop.eup %921 }
 0x2ca   :  { %v492_v17 = vmul.f32 %v922_v8, %v448_v2  ;;  %vm497_vm9 = vweird.f32 %v922_v8 }
 0x2cb   :  { %vm498_vm11 = vmor %vm496_vm10, %vm497_vm9 }
 0x2cc   :  { %v493_v21 = vsub.f32 1.0, %v492_v17 }
 0x2ce   :  { %v494_v26 = vmul.f32 %v922_v8, %v493_v21 }
 0x2d0   :  { %v495_v33 = vadd.f32 %v922_v8, %v494_v26 }
 0x2d2   :  { %v499_v40 = vsel %vm498_vm11, %v922_v8, %v495_v33 }
 0x2d3   :  { %v504_v47 = vsel %vm501_vm12, %v503_v42, %v499_v40 }
 0x315   :  { %v572_v51 = vpop.f32.mrf.mxu0 }
 0x31b   :  { %v543_v52 = vpop.f32.mrf.mxu3 }
 0x31c   :  { %v584_v53 = vmax.f32 %v543_v52, %v572_v51 }
 0x31e   :  { %585 = vmax.xlane.f32.xlu1 %v584_v53  ;;  %v704_v9 = vpop.permute.xlu2 %703 }
 0x323   :  { %v575_v54 = vpop.f32.mrf.mxu0 }
 0x329   :  { %v546_v55 = vpop.f32.mrf.mxu3 }
 0x32a   :  { %v587_v56 = vmax.f32 %v546_v55, %v575_v54 }
 0x32b   :  { %v578_v57 = vpop.f32.mrf.mxu0 }
 0x32c   :  { %588 = vmax.xlane.f32.xlu0 %v587_v56 }
 0x331   :  { %v549_v58 = vpop.f32.mrf.mxu3 }
 0x332   :  { %v590_v59 = vmax.f32 %v549_v58, %v578_v57 }
 0x333   :  { %v1348_v60 = vpop.f32.mrf.mxu0 }
 0x334   :  { %591 = vmax.xlane.f32.xlu1 %v590_v59 }
 0x339   :  { %v1350_v61 = vpop.f32.mrf.mxu3 }
 0x33a   :  { %v593_v62 = vmax.f32 %v1350_v61, %v1348_v60 }
 0x33c   :  { %594 = vmax.xlane.f32.xlu0 %v593_v62 }
 0x391   :  { %v586_v3 = vpop.xlane.xlu1 %585 }
 0x392   :  { %v596_v4 = vsub.f32 %v543_v52, %v586_v3  ;;  %v597_v5 = vsub.f32 %v572_v51, %v586_v3 }
 0x394   :  { %v604_v6 = vmul.f32 1.442695, %v596_v4  ;;  %v606_v7 = vmul.f32 1.442695, %v597_v5 }
 0x396   :  { %923 = vpow2.f32 %v604_v6 }
 0x397   :  { %925 = vpow2.f32 %v606_v7 }
 0x398   :  { %927 = vpow2.f32 %v437_v13 }
 0x39c   :  { %v1355_v10 = vpop.eup %923 }
 0x39d   :  { %v1357_v11 = vpop.eup %925 }
 0x39e   :  { %v620_v12 = vadd.f32 %v1357_v11, %v1355_v10  ;;  %v928_v27 = vpop.eup %927 }
 0x39f   :  { %v589_v14 = vpop.xlane.xlu0 %588  ;;  %v445_v35 = vadd.f32 1.0, %v928_v27 }
 0x3a0   :  { %v598_v15 = vsub.f32 %v546_v55, %v589_v14  ;;  %v599_v16 = vsub.f32 %v575_v54, %v589_v14  ;;  %621 = vadd.xlane.f32.xlu0 %v620_v12 }
 0x3a1   :  { %vm454_vm14 = vweird.f32 %v445_v35  ;;  %v458_v62 = vand.u32 2147483647, %v445_v35 }
 0x3a2   :  { %v608_v18 = vmul.f32 1.442695, %v598_v15  ;;  %v610_v19 = vmul.f32 1.442695, %v599_v16 }
 0x3a3   :  { %vm459_vm0 = vcmp.eq.f32.partialorder %v458_v62, 8.507059e+37 }
 0x3a4   :  { %929 = vpow2.f32 %v608_v18 }
 0x3a5   :  { %931 = vpow2.f32 %v610_v19 }
 0x3a6   :  { %933 = vpow2.f32 %v441_v22 }
 0x3a7   :  { %v592_v23 = vpop.xlane.xlu1 %591 }
 0x3a8   :  { %v600_v24 = vsub.f32 %v549_v58, %v592_v23  ;;  %v601_v25 = vsub.f32 %v578_v57, %v592_v23 }
 0x3aa   :  { %v1362_v28 = vpop.eup %929  ;;  %v612_v29 = vmul.f32 1.442695, %v600_v24  ;;  %v614_v30 = vmul.f32 1.442695, %v601_v25 }
 0x3ab   :  { %v1364_v31 = vpop.eup %931 }
 0x3ac   :  { %935 = vpow2.f32 %v612_v29  ;;  %v623_v32 = vadd.f32 %v1364_v31, %v1362_v28  ;;  %v934_v41 = vpop.eup %933 }
 0x3ad   :  { %937 = vpow2.f32 %v614_v30  ;;  %v447_v49 = vadd.f32 1.0, %v934_v41 }
 0x3ae   :  { %624 = vadd.xlane.f32.xlu2 %v623_v32  ;;  %939 = vrcp.f32 %v445_v35 }
 0x3af   :  { %v595_v37 = vpop.xlane.xlu0 %594  ;;  %v488_v4 = vand.u32 2147483648, %v447_v49  ;;  %vm482_vm2 = vweird.f32 %v447_v49  ;;  %v486_v5 = vand.u32 2147483647, %v447_v49 }
 0x3b0   :  { %v602_v38 = vsub.f32 %v1350_v61, %v595_v37  ;;  %v603_v39 = vsub.f32 %v1348_v60, %v595_v37  ;;  %v460_v61 = vand.u32 2147483648, %v445_v35 }
 0x3b1   :  { %v489_v7 = vor.u32 1.1754944e-38, %v488_v4  ;;  %vm487_vm4 = vcmp.eq.f32.partialorder %v486_v5, 8.507059e+37 }
 0x3b2   :  { %v1370_v43 = vpop.eup %935  ;;  %v616_v44 = vmul.f32 1.442695, %v602_v38  ;;  %v618_v45 = vmul.f32 1.442695, %v603_v39  ;;  %v461_v1 = vor.u32 1.1754944e-38, %v460_v61 }
 0x3b3   :  { %v1372_v46 = vpop.eup %937 }
 0x3b4   :  { %941 = vpow2.f32 %v616_v44  ;;  %713 = vperm.xlu0 %910, %v504_v47   ;;  %v626_v48 = vadd.f32 %v1372_v46, %v1370_v43  ;;  %v940_v50 = vpop.eup %939 }
 0x3b5   :  { %943 = vpow2.f32 %v618_v45  ;;  %v450_v53 = vmul.f32 %v940_v50, %v445_v35  ;;  %vm455_vm13 = vweird.f32 %v940_v50 }
 0x3b6   :  { %627 = vadd.xlane.f32.xlu1 %v626_v48  ;;  %945 = vrcp.f32 %v447_v49  ;;  %vm456_vm15 = vmor %vm454_vm14, %vm455_vm13 }
 0x3b7   :  { %v451_v56 = vsub.f32 1.0, %v450_v53 }
 0x3b9   :  { %v452_v58 = vmul.f32 %v940_v50, %v451_v56 }
 0x3ba   :  { %v1376_v51 = vpop.eup %941 }
 0x3bb   :  { %v1378_v52 = vpop.eup %943  ;;  %v453_v60 = vadd.f32 %v940_v50, %v452_v58 }
 0x3bc   :  { %v629_v54 = vadd.f32 %v1378_v52, %v1376_v51  ;;  %v946_v55 = vpop.eup %945 }
 0x3bd   :  { %v478_v57 = vmul.f32 %v946_v55, %v447_v49  ;;  %v457_v0 = vsel %vm456_vm15, %v940_v50, %v453_v60  ;;  %vm483_vm1 = vweird.f32 %v946_v55 }
 0x3be   :  { %630 = vadd.xlane.f32.xlu2 %v629_v54  ;;  %v462_v2 = vsel %vm459_vm0, %v461_v1, %v457_v0  ;;  %vm484_vm3 = vmor %vm482_vm2, %vm483_vm1 }
 0x3bf   :  { %v479_v59 = vsub.f32 1.0, %v478_v57 }
 0x3c1   :  { %v480_v63 = vmul.f32 %v946_v55, %v479_v59 }
 0x3c3   :  { %v481_v3 = vadd.f32 %v946_v55, %v480_v63 }
 0x3c5   :  { %v485_v6 = vsel %vm484_vm3, %v946_v55, %v481_v3 }
 0x3c6   :  { %v490_v8 = vsel %vm487_vm4, %v489_v7, %v485_v6 }
 0x3cf   :  { %698 = vperm.xlu1 %911, %v462_v2  }
 0x3d6   :  { %708 = vperm.xlu2 %909, %v490_v8  }
 0x413   :  { %v622_v12 = vpop.xlane.xlu0 %621 }
 0x414   :  { %947 = vrcp.f32 %v622_v12  ;;  %v643_v40 = vand.u32 2147483648, %v622_v12  ;;  %vm637_vm10 = vweird.f32 %v622_v12  ;;  %v641_v42 = vand.u32 2147483647, %v622_v12 }
 0x416   :  { %v644_v48 = vor.u32 1.1754944e-38, %v643_v40  ;;  %vm642_vm13 = vcmp.eq.f32.partialorder %v641_v42, 8.507059e+37 }
 0x41a   :  { %v948_v14 = vpop.eup %947 }
 0x41b   :  { %v633_v16 = vmul.f32 %v948_v14, %v622_v12  ;;  %vm638_vm9 = vweird.f32 %v948_v14  ;;  %v724_v12 = vld [vmem:[%s1475_s1] sm:$0xff] }
 0x41c   :  { %vm639_vm11 = vmor %vm637_vm10, %vm638_vm9 }
 0x41d   :  { %v634_v20 = vsub.f32 1.0, %v633_v16  ;;  %v727_v16 = vld [vmem:[%s1475_s1 + $0x18] sm:$0xff] }
 0x41f   :  { %v635_v26 = vmul.f32 %v948_v14, %v634_v20  ;;  %v729_v20 = vld [vmem:[%s1475_s1 + $0x28] sm:$0xff] }
 0x421   :  { %v625_v13 = vpop.xlane.xlu2 %624  ;;  %v636_v37 = vadd.f32 %v948_v14, %v635_v26  ;;  %v739_v26 = vld [vmem:[%s1475_s1 + $0x78] sm:$0xff] }
 0x422   :  { %949 = vrcp.f32 %v625_v13  ;;  %v657_v22 = vand.u32 2147483648, %v625_v13  ;;  %v655_v23 = vand.u32 2147483647, %v625_v13  ;;  %vm651_vm6 = vweird.f32 %v625_v13 }
 0x423   :  { %v640_v47 = vsel %vm639_vm11, %v948_v14, %v636_v37 }
 0x424   :  { %v658_v29 = vor.u32 1.1754944e-38, %v657_v22  ;;  %vm656_vm8 = vcmp.eq.f32.partialorder %v655_v23, 8.507059e+37  ;;  %v645_v53 = vsel %vm642_vm13, %v644_v48, %v640_v47  ;;  %v737_v22 = vld [vmem:[%s1475_s1 + $0x68] sm:$0xff]  ;;  %v730_v23 = vld [vmem:[%s1475_s1 + $0x30] sm:$0xff] }
 0x425   :  { %v688_v61 = vmul.f32 %v1355_v10, %v645_v53  ;;  %v689_v62 = vmul.f32 %v1357_v11, %v645_v53 }
 0x426   :  { %v714_v7 = vpop.permute.xlu0 %713 }
 0x428   :  { %v950_v15 = vpop.eup %949 }
 0x429   :  { %v647_v17 = vmul.f32 %v950_v15, %v625_v13  ;;  %v628_v18 = vpop.xlane.xlu1 %627  ;;  %vm652_vm5 = vweird.f32 %v950_v15  ;;  %v725_v13 = vld [vmem:[%s1475_s1 + $0x8] sm:$0xff] }
 0x42a   :  { %951 = vrcp.f32 %v628_v18  ;;  %vm653_vm7 = vmor %vm651_vm6, %vm652_vm5  ;;  %vm665_vm14 = vweird.f32 %v628_v18  ;;  %v669_v56 = vand.u32 2147483647, %v628_v18  ;;  %vm856_vm5 = vcmask 130048  }
 0x42b   :  { %v648_v19 = vsub.f32 1.0, %v647_v17  ;;  %v734_v17 = vld [vmem:[%s1475_s1 + $0x50] sm:$0xff] }
 0x42c   :  { %vm670_vm4 = vcmp.eq.f32.partialorder %v669_v56, 8.507059e+37 }
 0x42d   :  { %v649_v21 = vmul.f32 %v950_v15, %v648_v19  ;;  %v728_v19 = vld [vmem:[%s1475_s1 + $0x20] sm:$0xff] }
 0x42f   :  { %v650_v24 = vadd.f32 %v950_v15, %v649_v21  ;;  %v736_v21 = vld [vmem:[%s1475_s1 + $0x60] sm:$0xff] }
 0x430   :  { %v952_v25 = vpop.eup %951 }
 0x431   :  { %v654_v27 = vsel %vm653_vm7, %v950_v15, %v650_v24  ;;  %v661_v30 = vmul.f32 %v952_v25, %v628_v18  ;;  %v631_v32 = vpop.xlane.xlu2 %630  ;;  %vm666_vm12 = vweird.f32 %v952_v25  ;;  %v726_v15 = vld [vmem:[%s1475_s1 + $0x10] sm:$0xff]  ;;  %v731_v24 = vld [vmem:[%s1475_s1 + $0x38] sm:$0xff] }
 0x432   :  { %953 = vrcp.f32 %v631_v32  ;;  %v659_v34 = vsel %vm656_vm8, %v658_v29, %v654_v27  ;;  %v683_v55 = vand.u32 2147483647, %v631_v32  ;;  %vm667_vm0 = vmor %vm665_vm14, %vm666_vm12  ;;  %vm679_vm1 = vweird.f32 %v631_v32 }
 0x433   :  { %v662_v33 = vsub.f32 1.0, %v661_v30  ;;  %v690_v35 = vmul.f32 %v1362_v28, %v659_v34  ;;  %v691_v36 = vmul.f32 %v1364_v31, %v659_v34  ;;  %v685_v28 = vand.u32 2147483648, %v631_v32 }
 0x434   :  { %v671_v31 = vand.u32 2147483648, %v628_v18  ;;  %vm684_vm3 = vcmp.eq.f32.partialorder %v683_v55, 8.507059e+37  ;;  %v735_v18 = vld [vmem:[%s1475_s1 + $0x58] sm:$0xff] }
 0x435   :  { %v718_v38 = vmul.f32 %v704_v9, %v690_v35  ;;  %v719_v39 = vmul.f32 %v704_v9, %v691_v36  ;;  %v663_v41 = vmul.f32 %v952_v25, %v662_v33  ;;  %v686_v59 = vor.u32 1.1754944e-38, %v685_v28 }
 0x436   :  { %v672_v60 = vor.u32 1.1754944e-38, %v671_v31 }
 0x437   :  { %754 = vmatpush.xpose.msra.mxu3 %v718_v38  ;;  %783 = vmatpush.xpose.msra.mxu1 %v719_v39  ;;  %v664_v50 = vadd.f32 %v952_v25, %v663_v41 }
 0x438   :  { %v954_v44 = vpop.eup %953 }
 0x439   :  { %v675_v45 = vmul.f32 %v954_v44, %v631_v32  ;;  %vm680_vm15 = vweird.f32 %v954_v44  ;;  %v668_v58 = vsel %vm667_vm0, %v952_v25, %v664_v50  ;;  %v738_v25 = vld [vmem:[%s1475_s1 + $0x70] sm:$0xff] }
 0x43a   :  { %vm681_vm2 = vmor %vm679_vm1, %vm680_vm15  ;;  %v673_v1 = vsel %vm670_vm4, %v672_v60, %v668_v58 }
 0x43b   :  { %v676_v49 = vsub.f32 1.0, %v675_v45  ;;  %v692_v8 = vmul.f32 %v1370_v43, %v673_v1  ;;  %v693_v10 = vmul.f32 %v1372_v46, %v673_v1  ;;  %v732_v43 = vld [vmem:[%s1475_s1 + $0x40] sm:$0xff]  ;;  %v733_v46 = vld [vmem:[%s1475_s1 + $0x48] sm:$0xff] }
 0x43d   :  { %v677_v54 = vmul.f32 %v954_v44, %v676_v49 }
 0x43f   :  { %v678_v57 = vadd.f32 %v954_v44, %v677_v54 }
 0x441   :  { %v682_v63 = vsel %vm681_vm2, %v954_v44, %v678_v57  ;;  %v699_v0 = vpop.permute.xlu1 %698 }
 0x442   :  { %v716_v2 = vmul.f32 %v699_v0, %v688_v61  ;;  %v717_v3 = vmul.f32 %v699_v0, %v689_v62  ;;  %v687_v4 = vsel %vm684_vm3, %v686_v59, %v682_v63 }
 0x443   :  { %v694_v5 = vmul.f32 %v1376_v51, %v687_v4  ;;  %v695_v6 = vmul.f32 %v1378_v52, %v687_v4  ;;  %v709_v51 = vpop.permute.xlu2 %708 }
 0x444   :  { %755 = vmatpush.xpose.msra.mxu3 %v716_v2  ;;  %784 = vmatpush.xpose.msra.mxu1 %v717_v3  ;;  %v720_v52 = vmul.f32 %v709_v51, %v692_v8  ;;  %v721_v14 = vmul.f32 %v709_v51, %v693_v10 }
 0x445   :  { %v722_v11 = vmul.f32 %v714_v7, %v694_v5  ;;  %v723_v9 = vmul.f32 %v714_v7, %v695_v6 }
 0x447   :  { %812 = vmatpush.xpose.msrb.mxu2 %v722_v11  ;;  %841 = vmatpush.xpose.msra.mxu0 %v723_v9 }
 0x448   :  { %756 = vmatmul.f32.vlgmr.msra.gmra.mxu3 %v724_v12  ;;  %785 = vmatmul.f32.vlgmr.msra.gmra.mxu1 %v725_v13 }
 0x44b   :  { %813 = vmatpush.xpose.msrb.mxu2 %v720_v52  ;;  %842 = vmatpush.xpose.msra.mxu0 %v721_v14 }
 0x44e   :  { %814 = vmatmul.f32.vlgmr.msrb.gmra.mxu2 %v732_v43  ;;  %843 = vmatmul.f32.vlgmr.msra.gmra.mxu0 %v733_v46 }
 0x450   :  { %759 = vmatmul.f32.gmra.mxu3 %v726_v15  ;;  %788 = vmatmul.f32.gmra.mxu1 %v727_v16 }
 0x456   :  { %817 = vmatmul.f32.gmra.mxu2 %v734_v17  ;;  %846 = vmatmul.f32.gmra.mxu0 %v735_v18 }
 0x458   :  { %762 = vmatmul.f32.gmra.mxu3 %v728_v19  ;;  %791 = vmatmul.f32.gmra.mxu1 %v729_v20 }
 0x45e   :  { %820 = vmatmul.f32.gmra.mxu2 %v736_v21  ;;  %849 = vmatmul.f32.gmra.mxu0 %v737_v22 }
 0x460   :  { %765 = vmatmul.f32.gmra.mxu3 %v730_v23  ;;  %794 = vmatmul.f32.gmra.mxu1 %v731_v24 }
 0x466   :  { %823 = vmatmul.f32.gmra.mxu2 %v738_v25  ;;  %852 = vmatmul.f32.gmra.mxu0 %v739_v26 }
 0x4c5   :  { %v786_v27 = vpop.f32.mrf.mxu1 }
 0x4cb   :  { %v757_v29 = vpop.f32.mrf.mxu3  ;;  %v844_v30 = vpop.f32.mrf.mxu0 }
 0x4cc   :  { %v787_v32 = vadd.f32 %v786_v27, %v757_v29 }
 0x4cd   :  { %v789_v33 = vpop.f32.mrf.mxu1 }
 0x4ce   :  { %857 = vst.msk [vmem:[%s1476_s6] sm:$0xff] %vm856_vm5, %v787_v32 }
 0x4d1   :  { %v815_v34 = vpop.f32.mrf.mxu2 }
 0x4d2   :  { %v845_v35 = vadd.f32 %v844_v30, %v815_v34 }
 0x4d3   :  { %v760_v36 = vpop.f32.mrf.mxu3  ;;  %v847_v37 = vpop.f32.mrf.mxu0 }
 0x4d4   :  { %861 = vst.msk [vmem:[%s1476_s6 + $0x20] sm:$0xff] %vm856_vm5, %v845_v35  ;;  %v790_v38 = vadd.f32 %v789_v33, %v760_v36 }
 0x4d5   :  { %v792_v39 = vpop.f32.mrf.mxu1 }
 0x4d6   :  { %858 = vst.msk [vmem:[%s1476_s6 + $0x8] sm:$0xff] %vm856_vm5, %v790_v38 }
 0x4d9   :  { %v818_v40 = vpop.f32.mrf.mxu2 }
 0x4da   :  { %v848_v41 = vadd.f32 %v847_v37, %v818_v40 }
 0x4db   :  { %v763_v42 = vpop.f32.mrf.mxu3  ;;  %v850_v45 = vpop.f32.mrf.mxu0 }
 0x4dc   :  { %862 = vst.msk [vmem:[%s1476_s6 + $0x28] sm:$0xff] %vm856_vm5, %v848_v41  ;;  %v793_v44 = vadd.f32 %v792_v39, %v763_v42 }
 0x4dd   :  { %v795_v48 = vpop.f32.mrf.mxu1 }
 0x4de   :  { %859 = vst.msk [vmem:[%s1476_s6 + $0x10] sm:$0xff] %vm856_vm5, %v793_v44 }
 0x4e1   :  { %v821_v47 = vpop.f32.mrf.mxu2 }
 0x4e2   :  { %v851_v49 = vadd.f32 %v850_v45, %v821_v47 }
 0x4e3   :  { %v766_v50 = vpop.f32.mrf.mxu3  ;;  %v853_v31 = vpop.f32.mrf.mxu0 }
 0x4e4   :  { %863 = vst.msk [vmem:[%s1476_s6 + $0x30] sm:$0xff] %vm856_vm5, %v851_v49  ;;  %v796_v28 = vadd.f32 %v795_v48, %v766_v50 }
 0x4e6   :  { %860 = vst.msk [vmem:[%s1476_s6 + $0x18] sm:$0xff] %vm856_vm5, %v796_v28 }
 0x4e9   :  { %v824_v53 = vpop.f32.mrf.mxu2 }
 0x4ea   :  { %v854_v54 = vadd.f32 %v853_v31, %v824_v53 }
 0x4ec   :  { %864 = vst.msk [vmem:[%s1476_s6 + $0x38] sm:$0xff] %vm856_vm5, %v854_v54 }

</bundles_post_ra>
